<compile_context>
chip_gen: v7x
topology: tpu7x:2x2x1
jax: 0.10.0
libtpu: 0.0.40
codegen_flags: <defaults>
</compile_context>

<pallas_src>
import math
import functools

import jax
import jax.numpy as jnp
from jax.experimental import pallas as pl
from jax.experimental.pallas import tpu as pltpu


_LANE = 128
_TARGET_TILE_BYTES = 2 * 1024 * 1024  # ~2 MiB of live buffers per pipeline step


# -----------------------------------------------------------------------------
# Parameter / buffer construction (plain JAX glue — matches torch __init__)
# -----------------------------------------------------------------------------
def make_positional_encoding_table(max_len: int, feat_dim: int,
                                   dtype=jnp.float32) -> jnp.ndarray:
    """Deterministic sinusoidal table, identical to the torch buffer `pe`."""
    position = jnp.arange(0, max_len, dtype=jnp.float32)[:, None]          # (L, 1)
    div_term = jnp.exp(
        jnp.arange(0, feat_dim, 2, dtype=jnp.float32)
        * (-math.log(10000.0) / feat_dim))                                  # (D/2,)
    pe = jnp.zeros((max_len, feat_dim), dtype=jnp.float32)
    pe = pe.at[:, 0::2].set(jnp.sin(position * div_term))
    pe = pe.at[:, 1::2].set(jnp.cos(position * div_term))
    return pe.astype(dtype)                                                 # (L, D)


# -----------------------------------------------------------------------------
# Pallas kernels (elementwise hot path: add + optional fused dropout select)
# -----------------------------------------------------------------------------
def _pe_add_eval_kernel(x_ref, pe_ref, o_ref):
    # x_ref/o_ref: (B, tF); pe_ref: (1, tF) — broadcast over batch sublanes.
    o_ref[...] = x_ref[...] + pe_ref[...]


def _pe_add_dropout_kernel(x_ref, pe_ref, u_ref, o_ref, *, keep_prob, inv_keep):
    # u_ref: (B, tF) uniform [0,1) f32; keep iff u < keep_prob, scale by 1/keep.
    y = x_ref[...] + pe_ref[...]
    keep = u_ref[...] < jnp.float32(keep_prob)
    o_ref[...] = jnp.where(keep,
                           y * jnp.asarray(inv_keep, dtype=y.dtype),
                           jnp.zeros_like(y))


# -----------------------------------------------------------------------------
# Tile sizing: largest multiple-of-128 flat tile keeping live buffers ~2 MiB.
# -----------------------------------------------------------------------------
def _choose_flat_tile(flat_len: int, bytes_per_flat_elem: int,
                      target_bytes: int = _TARGET_TILE_BYTES) -> int:
    if flat_len * bytes_per_flat_elem <= target_bytes:
        return flat_len                       # one block covering the whole axis
    t = (target_bytes // bytes_per_flat_elem) // _LANE * _LANE
    return max(_LANE, min(int(t), flat_len))


# -----------------------------------------------------------------------------
# Wrapper
# -----------------------------------------------------------------------------
def positional_encoding(x, pe_table, *, dropout_p=0.1, training=False,
                        rng_key=None):
    """x: (B, S, D); pe_table: (max_len, D) with max_len >= S."""
    B, S, D = x.shape
    F = S * D
    dtype = x.dtype
    itemsize = jnp.dtype(dtype).itemsize

    # Lane-dense, free reshapes; pre-cast PE to the activation dtype.
    x_flat = x.reshape(B, F)
    pe_flat = pe_table[:S, :].astype(dtype).reshape(1, F)

    train = bool(training) and float(dropout_p) > 0.0

    # Bytes moved per flat element per step (x in + out + pe, plus f32 randoms
    # in training mode) — used to size the tile and for the cost estimate.
    bytes_per_flat = (2 * B + 1) * itemsize + (4 * B if train else 0)
    tF = _choose_flat_tile(F, bytes_per_flat)
    grid = (pl.cdiv(F, tF),)

    x_spec = pl.BlockSpec((B, tF), lambda f: (0, f))
    pe_spec = pl.BlockSpec((1, tF), lambda f: (0, f))
    out_spec = pl.BlockSpec((B, tF), lambda f: (0, f))

    cparams = pltpu.CompilerParams(dimension_semantics=("parallel",))
    cost = pl.CostEstimate(flops=(2 if train else 1) * B * F,
                           transcendentals=0,
                           bytes_accessed=int(F * bytes_per_flat))

    if not train:
        y_flat = pl.pallas_call(
            _pe_add_eval_kernel,
            out_shape=jax.ShapeDtypeStruct((B, F), dtype),
            grid=grid,
            in_specs=[x_spec, pe_spec],
            out_specs=out_spec,
            compiler_params=cparams,
            cost_estimate=cost,
        )(x_flat, pe_flat)
        return y_flat.reshape(B, S, D)

    if rng_key is None:
        rng_key = jax.random.PRNGKey(0)
    keep_prob = 1.0 - float(dropout_p)
    u = jax.random.uniform(rng_key, (B, F), dtype=jnp.float32)
    u_spec = pl.BlockSpec((B, tF), lambda f: (0, f))

    kernel = functools.partial(_pe_add_dropout_kernel,
                               keep_prob=keep_prob,
                               inv_keep=1.0 / keep_prob)
    y_flat = pl.pallas_call(
        kernel,
        out_shape=jax.ShapeDtypeStruct((B, F), dtype),
        grid=grid,
        in_specs=[x_spec, pe_spec, u_spec],
        out_specs=out_spec,
        compiler_params=cparams,
        cost_estimate=cost,
    )(x_flat, pe_flat, u)
    return y_flat.reshape(B, S, D)


# -----------------------------------------------------------------------------
# Demo / correctness check
# -----------------------------------------------------------------------------
if __name__ == "__main__":
    B, S, D = 2, 8, 32        # small shapes: batch=2, seq=8, feat_dim=32
    MAX_LEN = 64              # stand-in for max_len=5000 at small scale

    key = jax.random.PRNGKey(0)
    kx, kd = jax.random.split(key)
    x = jax.random.normal(kx, (B, S, D), dtype=jnp.float32)

    pe_table = make_positional_encoding_table(MAX_LEN, D)
    y_ref = x + pe_table[None, :S, :]

    # Eval mode (dropout is identity) — exact match against the reference.
    y = positional_encoding(x, pe_table, dropout_p=0.1, training=False)
    y = jax.block_until_ready(y)
    assert y.shape == x.shape and y.dtype == x.dtype
    assert jnp.allclose(y, y_ref, atol=1e-6, rtol=1e-6), "eval mismatch vs reference"

    # Training mode — every output entry must be either 0 (dropped) or
    # (x + pe) / keep_prob (kept & rescaled).
    p = 0.1
    y_tr = positional_encoding(x, pe_table, dropout_p=p, training=True, rng_key=kd)
    y_tr = jax.block_until_ready(y_tr)
    assert y_tr.shape == x.shape and y_tr.dtype == x.dtype
    scaled = y_ref / (1.0 - p)
    ok = jnp.isclose(y_tr, 0.0, atol=1e-6) | jnp.isclose(y_tr, scaled,
                                                         atol=1e-5, rtol=1e-5)
    assert bool(jnp.all(ok)), "train-mode values are not {0, (x+pe)/keep_prob}"

    print("KERNEL_OK")
</pallas_src>

<mosaic_0001>
module attributes {stable_mosaic.version = 11 : i64} {
  func.func @_pe_add_eval_kernel(%arg0: i32, %arg1: memref<2x256xf32, #tpu.memory_space<vmem>>, %arg2: memref<1x256xf32, #tpu.memory_space<vmem>>, %arg3: memref<2x256xf32, #tpu.memory_space<vmem>>) attributes {dimension_semantics = [#tpu.dimension_semantics<parallel>], iteration_bounds = array<i64: 1>, scalar_prefetch = 0 : i64, scratch_operands = 0 : i64, tpu.core_type = #tpu.core_type<tc>, window_params = [{transform_indices = @transform_0, window_bounds = array<i64: 2, 256>}, {transform_indices = @transform_1, window_bounds = array<i64: 1, 256>}, {transform_indices = @transform_2, window_bounds = array<i64: 2, 256>}]} {
    %c0 = arith.constant 0 : index
    %c0_0 = arith.constant 0 : index
    %0 = vector.load %arg1[%c0, %c0_0] : memref<2x256xf32, #tpu.memory_space<vmem>>, vector<2x256xf32>
    %c0_1 = arith.constant 0 : index
    %c0_2 = arith.constant 0 : index
    %1 = vector.load %arg2[%c0_1, %c0_2] : memref<1x256xf32, #tpu.memory_space<vmem>>, vector<1x256xf32>
    %2 = vector.broadcast %1 : vector<1x256xf32> to vector<2x256xf32>
    %3 = arith.addf %0, %2 : vector<2x256xf32>
    %c0_3 = arith.constant 0 : index
    %c0_4 = arith.constant 0 : index
    %4 = vector.load %arg3[%c0_3, %c0_4] : memref<2x256xf32, #tpu.memory_space<vmem>>, vector<2x256xf32>
    tpu.vector_store %arg3[%c0_3, %c0_4], %3 {strides = array<i32>} : memref<2x256xf32, #tpu.memory_space<vmem>>, vector<2x256xf32>,
    return
  }
  func.func @transform_0(%arg0: i32) -> (i32, i32) {
    %c0_i32 = arith.constant 0 : i32
    %c0_i32_0 = arith.constant 0 : i32
    return %c0_i32, %arg0 : i32, i32
  }
  func.func @transform_1(%arg0: i32) -> (i32, i32) {
    %c0_i32 = arith.constant 0 : i32
    %c0_i32_0 = arith.constant 0 : i32
    return %c0_i32, %arg0 : i32, i32
  }
  func.func @transform_2(%arg0: i32) -> (i32, i32) {
    %c0_i32 = arith.constant 0 : i32
    %c0_i32_0 = arith.constant 0 : i32
    return %c0_i32, %arg0 : i32, i32
  }
}

</mosaic_0001>

<bundles_post_ra>
// kernel: tpu_custom_call.1
= control target key start
LH: loop header
LB: loop body
LE: loop exit
PB: predicated region body
PF: predicated region fallthrough
CT: control target
= control target key end

     0   :  { %7 = vsyncpa [#allocation3], 0  ;;  %s157_s0 = inlined_call_operand.hbm [shape: f32[2,256], index: 0, kind: input, shape index: {}]   ;;  %s158_s1 = inlined_call_operand.vmem [shape: f32[1,256], index: 1, kind: input, shape index: {}]   ;;  %s159_s2 = inlined_call_operand.hbm [shape: f32[2,256], index: 2, kind: output, shape index: {}]  }
   0x1   :  { %8 = vsyncpa [#allocation4], 0  ;;  %s112_s9 = smov [#allocation2]   ;;  %s64_s13 = scalar_lea.hbm %s157_s0, 64 }
   0x2   :  { %s15_s10 = sshll.u32 %s112_s9, 4  ;;  %p65_p0 = scmp.ne.s32.totalorder %s157_s0, %s64_s13  ;;  %s16_s10 = int_to_ptr.vmem [resolvable:$true] %s15_s10 }
   0x3   :  { %p68_p1 = scmp.lt.u32.totalorder %s64_s13, %s157_s0 }
   0x5   :  { %p70_p2 = pnand %p68_p1, %p65_p0 }
   0x7   :  { %73 = shalt.err (!%p70_p2)
}
   0x8   :  { %s74_s18 = scalar_lea.vmem %s16_s10, 64  ;;  %p79_p4 = scmp.lt.s32.totalorder %s16_s10, %s16_s10 }
   0x9   :  { %p75_p3 = scmp.ne.s32.totalorder %s16_s10, %s74_s18  ;;  %p80_p5 = scmp.lt.s32.totalorder %s74_s18, %s74_s18 }
   0xb   :  { %p81_p6 = por %p80_p5, %p79_p4 }
   0xd   :  { %p82_p7 = pnand %p81_p6, %p75_p3 }
   0xf   :  { %85 = shalt.err (!%p82_p7)
}
  0x10   :  { %18 = dma.hbm_to_vmem [thread:$0]  %s157_s0, 64, %s16_s10, [#allocation3]  }
  0x11   :  { %108 = dma.done.wait [#allocation3], 64  }
  0x12   :  { %109 = vsyncadd [#allocation3], 4294967232  ;;  %v27_v0 = vlaneseq  ;;  %v113_v1 = vmov 1983009808   ;;  %v25_v7 = vld [vmem:[%s158_s1] sm:$0x3] }
  0x13   :  { %v37_v2 = vunpack.c.l.s4 %v113_v1  ;;  %v24_v12 = vld [vmem:[#allocation2] sm:$0xf]  ;;  %s114_s23 = smov [#allocation5]  }
  0x14   :  { %v28_v3 = vshrl.u32 %v27_v0, 7  ;;  %s52_s0 = sshll.u32 %s114_s23, 4  ;;  %s53_s0 = int_to_ptr.vmem [resolvable:$true] %s52_s0 }
  0x15   :  { %v38_v6 = vunpack.c.0.s8 %v37_v2  ;;  %s86_s24 = scalar_lea.vmem %s53_s0, 64  ;;  %p91_p9 = scmp.lt.s32.totalorder %s53_s0, %s53_s0 }
  0x16   :  { %v29_v4 = vsub.s32 0, %v28_v3  ;;  %v33_v5 = vsub.s32 1, %v28_v3  ;;  %p87_p8 = scmp.ne.s32.totalorder %s53_s0, %s86_s24  ;;  %p92_p10 = scmp.lt.s32.totalorder %s86_s24, %s86_s24 }
  0x17   :  { %v41_v10 = vsub.s32 %v38_v6, %v28_v3 }
  0x18   :  { %v30_v8 = vrot.slane %v25_v7, %v29_v4  ;;  %v34_v9 = vrot.slane %v25_v7, %v33_v5  ;;  %p93_p11 = por %p92_p10, %p91_p9 }
  0x1a   :  { %v35_v11 = vcombine.low %v30_v8, %v34_v9  ;;  %p94_p12 = pnand %p93_p11, %p87_p8 }
  0x1c   :  { %v42_v13 = vrot.slane %v35_v11, %v41_v10 }
  0x1e   :  { %v44_v14 = vadd.f32 %v42_v13, %v24_v12 }
  0x20   :  { %45 = vst [vmem:[#allocation5] sm:$0xf] %v44_v14 }
  0x21   :  { %97 = shalt.err (!%p94_p12)
}
  0x22   :  { %s98_s26 = scalar_lea.hbm %s159_s2, 64 }
  0x23   :  { %p99_p13 = scmp.ne.s32.totalorder %s159_s2, %s98_s26  ;;  %p102_p0 = scmp.lt.u32.totalorder %s98_s26, %s159_s2 }
  0x25   :  { %p104_p1 = pnand %p102_p0, %p99_p13 }
  0x27   :  { %107 = shalt.err (!%p104_p1)
}
  0x28   :  { %55 = dma.vmem_to_hbm [thread:$0]  %s53_s0, 64, %s159_s2, [#allocation4]  }
  0x29   :  { %110 = dma.done.wait [#allocation4], 64  }
  0x2a   :  { %111 = vsyncadd [#allocation4], 4294967232 }
  0x2b   :  { %59 = vsyncpa [#allocation3], 1 }
  0x2c   :  { %60 = vsyncpa [#allocation4], 1 }

</bundles_post_ra>
